<compile_context>
chip_gen: v7x
topology: tpu7x:2x2x1
jax: 0.10.0
libtpu: 0.0.40
codegen_flags: <defaults>
</compile_context>

<pallas_src>
import jax
import jax.numpy as jnp
from jax.experimental import pallas as pl
from jax.experimental.pallas import tpu as pltpu


def _round_up(x, m):
    return -(-x // m) * m


def decision_head_kernel(lens_ref,             # SMEM (B_pad,) int32  (scalar prefetch)
                         x_ref,                # (TB, R, H)  encoded rule/user states
                         we_ref, be_ref,       # (H,3), (1,3)   w_entail
                         wc_ref, bc_ref,       # (H,H), (1,H)   fused w_entail@entail_emb
                         wsae_ref, wsax_ref,   # (1,H), (1,H)   w_selfattn split rows
                         bsa_ref,              # (1,1)
                         woe_ref, wox_ref,     # (H,3), (H,3)   w_output split
                         bo_ref,               # (1,3)
                         entail_ref,           # out (TB, R, 3)
                         clf_ref):             # out (TB, 3)
    TB, R, H = x_ref.shape
    x = x_ref[...]                                          # (TB, R, H)
    x2d = x.reshape(TB * R, H)                              # M = TB*R rows for the MXU

    # ---- entailment logits (module output `entail_score_pred`) ----------------
    e_logits = (jnp.dot(x2d, we_ref[...], preferred_element_type=jnp.float32)
                + be_ref[...])                              # (TB*R, 3)
    entail_ref[...] = e_logits.reshape(TB, R, 3).astype(entail_ref.dtype)

    # ---- entail_state, fused: (x@We + be)@Emb == x@(We@Emb) + be@Emb ----------
    e_state = (jnp.dot(x2d, wc_ref[...], preferred_element_type=jnp.float32)
               + bc_ref[...]).reshape(TB, R, H)             # (TB, R, H)

    # ---- self-attn logits over rules without concat: cat@Wsa ==
    #      e_state@Wsa[:H] + x@Wsa[H:]   (VPU multiply + lane reduce, no MXU) --
    attn = (jnp.sum(e_state * wsae_ref[...][None], axis=-1, keepdims=True)
            + jnp.sum(x * wsax_ref[...][None], axis=-1, keepdims=True)
            + bsa_ref[...])                                 # (TB, R, 1)

    # ---- masked softmax over the rule axis; mask built from scalar-prefetched
    #      per-example rule counts (no (B,R,1) mask DMA) ------------------------
    base = pl.program_id(0) * TB
    row_ids = jax.lax.broadcasted_iota(jnp.int32, (TB, R, 1), 1)
    bidx = jax.lax.broadcasted_iota(jnp.int32, (TB, 1, 1), 0)
    lens_col = jnp.zeros((TB, 1, 1), jnp.int32)
    for i in range(TB):                                     # TB is static & small
        lens_col = jnp.where(bidx == i, lens_ref[base + i], lens_col)
    attn = jnp.where(row_ids < lens_col, attn, -jnp.inf)

    m = jnp.max(attn, axis=1, keepdims=True)                # (TB, 1, 1)
    p = jnp.exp(attn - m)                                   # (TB, R, 1)
    denom = jnp.sum(p, axis=1, keepdims=True)               # (TB, 1, 1)
    # Exact division keeps us within tight tolerance of the reference; switch to
    # p * pl.reciprocal(denom, approx=True) if a looser tolerance is acceptable.
    w = p / denom                                           # (TB, R, 1)

    # ---- weighted pooling + output projection (split, no concat) --------------
    pooled_e = jnp.sum(w * e_state, axis=1)                 # (TB, H)
    pooled_x = jnp.sum(w * x, axis=1)                       # (TB, H)
    score = (jnp.dot(pooled_e, woe_ref[...], preferred_element_type=jnp.float32)
             + jnp.dot(pooled_x, wox_ref[...], preferred_element_type=jnp.float32)
             + bo_ref[...])                                 # (TB, 3)
    clf_ref[...] = score.astype(clf_ref.dtype)


def decision_head(tenc_out, rule_lens, params, *, max_tile_b=8):
    """tenc_out: (B, R, H) f32; rule_lens: (B,) int32 = number of valid rules per example."""
    B, R, H = tenc_out.shape

    # Batch tile: amortize per-grid-step overhead and feed the (H,H) matmul TB*R rows.
    # Keep TB == whole (small) batch or a multiple of 8 so tiled second-minor dims stay
    # sublane-aligned; tiles are tiny, so this fits comfortably in VMEM on v5e/v6e/v7x.
    TB = B if B <= max_tile_b else max_tile_b
    B_pad = _round_up(B, TB)
    R_pad = _round_up(R, 8)

    x = tenc_out
    lens = jnp.asarray(rule_lens, jnp.int32)
    if R_pad != R:
        x = jnp.pad(x, ((0, 0), (0, R_pad - R), (0, 0)))
    if B_pad != B:
        x = jnp.pad(x, ((0, B_pad - B), (0, 0), (0, 0)))
        # padded examples: mark all rules valid so their (discarded) softmax stays finite
        lens = jnp.concatenate([lens, jnp.full((B_pad - B,), R_pad, jnp.int32)])

    # ---- parameter prep (tiny one-time XLA ops) -----------------------------------
    we = params["w_entail"]                       # (H, 3)
    be = params["b_entail"].reshape(1, 3)
    emb = params["entail_emb"]                    # (3, H)
    wc = we @ emb                                 # (H, H) fused weight
    bc = be @ emb                                 # (1, H) fused bias
    wsa = params["w_selfattn"]                    # (2H, 1)
    bsa = params["b_selfattn"].reshape(1, 1)
    wsa_e = wsa[:H].T                             # (1, H)
    wsa_x = wsa[H:].T                             # (1, H)
    wo = params["w_output"]                       # (2H, 3)
    bo = params["b_output"].reshape(1, 3)
    wo_e = wo[:H]                                 # (H, 3)
    wo_x = wo[H:]                                 # (H, 3)

    def full(a):
        return pl.BlockSpec(a.shape, lambda t, lens_ref, nd=a.ndim: (0,) * nd)

    entail, clf = pl.pallas_call(
        decision_head_kernel,
        out_shape=(jax.ShapeDtypeStruct((B_pad, R_pad, 3), jnp.float32),
                   jax.ShapeDtypeStruct((B_pad, 3), jnp.float32)),
        grid_spec=pltpu.PrefetchScalarGridSpec(
            num_scalar_prefetch=1,                # rule lengths -> SMEM
            grid=(B_pad // TB,),
            in_specs=[
                pl.BlockSpec((TB, R_pad, H), lambda t, lens_ref: (t, 0, 0)),
                full(we), full(be), full(wc), full(bc),
                full(wsa_e), full(wsa_x), full(bsa),
                full(wo_e), full(wo_x), full(bo),
            ],
            out_specs=[
                pl.BlockSpec((TB, R_pad, 3), lambda t, lens_ref: (t, 0, 0)),
                pl.BlockSpec((TB, 3), lambda t, lens_ref: (t, 0)),
            ],
        ),
        compiler_params=pltpu.CompilerParams(dimension_semantics=("parallel",)),
    )(lens, x, we, be, wc, bc, wsa_e, wsa_x, bsa, wo_e, wo_x, bo)

    return entail[:B, :R, :], clf[:B]


def reference(tenc_out, rule_lens, params):
    """Pure-JAX reference mirroring the PyTorch forward / logic_op (eval mode)."""
    B, R, H = tenc_out.shape
    e_logits = tenc_out @ params["w_entail"] + params["b_entail"]          # (B,R,3)
    e_state = e_logits @ params["entail_emb"]                              # (B,R,H)
    cat = jnp.concatenate([e_state, tenc_out], axis=-1)                    # (B,R,2H)
    attn = cat @ params["w_selfattn"] + params["b_selfattn"]               # (B,R,1)
    mask = jnp.arange(R)[None, :, None] < rule_lens[:, None, None]
    attn = jnp.where(mask, attn, -jnp.inf)
    w = jax.nn.softmax(attn, axis=1)
    pooled = jnp.sum(w * cat, axis=1)                                      # (B,2H)
    score = pooled @ params["w_output"] + params["b_output"]               # (B,3)
    return e_logits, score


if __name__ == "__main__":
    B, R, H = 2, 8, 32   # batch, max rules per example, bert_hidden_size

    key = jax.random.PRNGKey(0)
    ks = jax.random.split(key, 8)

    # Synthetic encoder output (stands in for gathered RoBERTa hidden states).
    tenc_out = jax.random.normal(ks[0], (B, R, H), dtype=jnp.float32)
    # First example has 8 valid rules, second has 5 (rest padded).
    rule_lens = jnp.array([8, 5], dtype=jnp.int32)

    # Deterministic parameter init (shapes follow Module.__init__).
    params = {
        "w_entail":   jax.random.normal(ks[1], (H, 3), jnp.float32) * 0.1,
        "b_entail":   jax.random.normal(ks[2], (1, 3), jnp.float32) * 0.1,
        "entail_emb": jax.random.normal(ks[3], (3, H), jnp.float32),       # nn.init.normal_
        "w_selfattn": jax.random.normal(ks[4], (2 * H, 1), jnp.float32) * 0.1,
        "b_selfattn": jax.random.normal(ks[5], (1, 1), jnp.float32) * 0.1,
        "w_output":   jax.random.normal(ks[6], (2 * H, 3), jnp.float32) * 0.1,
        "b_output":   jax.random.normal(ks[7], (1, 3), jnp.float32) * 0.1,
    }

    entail_pred, clf_score = decision_head(tenc_out, rule_lens, params)
    jax.block_until_ready((entail_pred, clf_score))

    ref_entail, ref_clf = reference(tenc_out, rule_lens, params)
    assert entail_pred.shape == (B, R, 3) and clf_score.shape == (B, 3)
    assert jnp.allclose(entail_pred, ref_entail, rtol=1e-4, atol=1e-4)
    # The fused (w_entail@entail_emb) weight and split projections reorder f32
    # accumulations relative to the reference, so give clf a little extra slack.
    assert jnp.allclose(clf_score, ref_clf, rtol=1e-3, atol=1e-3)

    print("KERNEL_OK")
</pallas_src>

<mosaic_0001>
module attributes {stable_mosaic.version = 11 : i64} {
  func.func @decision_head_kernel(%arg0: i32, %arg1: memref<2xi32, #tpu.memory_space<smem>>, %arg2: memref<2x8x32xf32, #tpu.memory_space<vmem>>, %arg3: memref<32x3xf32, #tpu.memory_space<vmem>>, %arg4: memref<1x3xf32, #tpu.memory_space<vmem>>, %arg5: memref<32x32xf32, #tpu.memory_space<vmem>>, %arg6: memref<1x32xf32, #tpu.memory_space<vmem>>, %arg7: memref<1x32xf32, #tpu.memory_space<vmem>>, %arg8: memref<1x32xf32, #tpu.memory_space<vmem>>, %arg9: memref<1x1xf32, #tpu.memory_space<vmem>>, %arg10: memref<32x3xf32, #tpu.memory_space<vmem>>, %arg11: memref<32x3xf32, #tpu.memory_space<vmem>>, %arg12: memref<1x3xf32, #tpu.memory_space<vmem>>, %arg13: memref<2x8x3xf32, #tpu.memory_space<vmem>>, %arg14: memref<2x3xf32, #tpu.memory_space<vmem>>) attributes {dimension_semantics = [#tpu.dimension_semantics<parallel>], iteration_bounds = array<i64: 1>, scalar_prefetch = 1 : i64, scratch_operands = 0 : i64, tpu.core_type = #tpu.core_type<tc>, window_params = [{transform_indices = @transform_0, window_bounds = array<i64: 2, 8, 32>}, {pipeline_mode = #tpu.pipeline_mode<synchronous>, transform_indices = @transform_1, window_bounds = array<i64: 32, 3>}, {pipeline_mode = #tpu.pipeline_mode<synchronous>, transform_indices = @transform_2, window_bounds = array<i64: 1, 3>}, {pipeline_mode = #tpu.pipeline_mode<synchronous>, transform_indices = @transform_3, window_bounds = array<i64: 32, 32>}, {pipeline_mode = #tpu.pipeline_mode<synchronous>, transform_indices = @transform_4, window_bounds = array<i64: 1, 32>}, {pipeline_mode = #tpu.pipeline_mode<synchronous>, transform_indices = @transform_5, window_bounds = array<i64: 1, 32>}, {pipeline_mode = #tpu.pipeline_mode<synchronous>, transform_indices = @transform_6, window_bounds = array<i64: 1, 32>}, {pipeline_mode = #tpu.pipeline_mode<synchronous>, transform_indices = @transform_7, window_bounds = array<i64: 1, 1>}, {pipeline_mode = #tpu.pipeline_mode<synchronous>, transform_indices = @transform_8, window_bounds = array<i64: 32, 3>}, {pipeline_mode = #tpu.pipeline_mode<synchronous>, transform_indices = @transform_9, window_bounds = array<i64: 32, 3>}, {pipeline_mode = #tpu.pipeline_mode<synchronous>, transform_indices = @transform_10, window_bounds = array<i64: 1, 3>}, {transform_indices = @transform_11, window_bounds = array<i64: 2, 8, 3>}, {transform_indices = @transform_12, window_bounds = array<i64: 2, 3>}]} {
    %c0 = arith.constant 0 : index
    %c0_0 = arith.constant 0 : index
    %c0_1 = arith.constant 0 : index
    %0 = vector.load %arg2[%c0, %c0_0, %c0_1] : memref<2x8x32xf32, #tpu.memory_space<vmem>>, vector<2x8x32xf32>
    %1 = vector.shape_cast %0 : vector<2x8x32xf32> to vector<16x32xf32>
    %c0_2 = arith.constant 0 : index
    %c0_3 = arith.constant 0 : index
    %2 = vector.load %arg3[%c0_2, %c0_3] : memref<32x3xf32, #tpu.memory_space<vmem>>, vector<32x3xf32>
    %cst = arith.constant dense<0.000000e+00> : vector<16x3xf32>
    %3 = tpu.matmul %1, %2, %cst {dimension_numbers = #tpu.dot_dimension_numbers<[1], [0], [0], [1], [0, 0, 1, 1], [], []>} : vector<16x32xf32>, vector<32x3xf32>, vector<16x3xf32> -> vector<16x3xf32>
    %c0_4 = arith.constant 0 : index
    %c0_5 = arith.constant 0 : index
    %4 = vector.load %arg4[%c0_4, %c0_5] : memref<1x3xf32, #tpu.memory_space<vmem>>, vector<1x3xf32>
    %5 = vector.broadcast %4 : vector<1x3xf32> to vector<16x3xf32>
    %6 = arith.addf %3, %5 : vector<16x3xf32>
    %7 = vector.shape_cast %6 : vector<16x3xf32> to vector<2x8x3xf32>
    %c0_6 = arith.constant 0 : index
    %c0_7 = arith.constant 0 : index
    %c0_8 = arith.constant 0 : index
    %8 = vector.load %arg13[%c0_6, %c0_7, %c0_8] : memref<2x8x3xf32, #tpu.memory_space<vmem>>, vector<2x8x3xf32>
    tpu.vector_store %arg13[%c0_6, %c0_7, %c0_8], %7 {strides = array<i32>} : memref<2x8x3xf32, #tpu.memory_space<vmem>>, vector<2x8x3xf32>,
    %c0_9 = arith.constant 0 : index
    %c0_10 = arith.constant 0 : index
    %9 = vector.load %arg5[%c0_9, %c0_10] : memref<32x32xf32, #tpu.memory_space<vmem>>, vector<32x32xf32>
    %cst_11 = arith.constant dense<0.000000e+00> : vector<16x32xf32>
    %10 = tpu.matmul %1, %9, %cst_11 {dimension_numbers = #tpu.dot_dimension_numbers<[1], [0], [0], [1], [0, 0, 1, 1], [], []>} : vector<16x32xf32>, vector<32x32xf32>, vector<16x32xf32> -> vector<16x32xf32>
    %c0_12 = arith.constant 0 : index
    %c0_13 = arith.constant 0 : index
    %11 = vector.load %arg6[%c0_12, %c0_13] : memref<1x32xf32, #tpu.memory_space<vmem>>, vector<1x32xf32>
    %12 = vector.broadcast %11 : vector<1x32xf32> to vector<16x32xf32>
    %13 = arith.addf %10, %12 : vector<16x32xf32>
    %14 = vector.shape_cast %13 : vector<16x32xf32> to vector<2x8x32xf32>
    %c0_14 = arith.constant 0 : index
    %c0_15 = arith.constant 0 : index
    %15 = vector.load %arg7[%c0_14, %c0_15] : memref<1x32xf32, #tpu.memory_space<vmem>>, vector<1x32xf32>
    %16 = vector.shape_cast %15 : vector<1x32xf32> to vector<1x1x32xf32>
    %17 = vector.broadcast %16 : vector<1x1x32xf32> to vector<2x8x32xf32>
    %18 = arith.mulf %14, %17 : vector<2x8x32xf32>
    %cst_16 = arith.constant dense<0.000000e+00> : vector<2x8xf32>
    %19 = vector.multi_reduction <add>, %18, %cst_16 [2] : vector<2x8x32xf32> to vector<2x8xf32>
    %20 = vector.shape_cast %19 : vector<2x8xf32> to vector<2x8x1xf32>
    %c0_17 = arith.constant 0 : index
    %c0_18 = arith.constant 0 : index
    %21 = vector.load %arg8[%c0_17, %c0_18] : memref<1x32xf32, #tpu.memory_space<vmem>>, vector<1x32xf32>
    %22 = vector.shape_cast %21 : vector<1x32xf32> to vector<1x1x32xf32>
    %23 = vector.broadcast %22 : vector<1x1x32xf32> to vector<2x8x32xf32>
    %24 = arith.mulf %0, %23 : vector<2x8x32xf32>
    %cst_19 = arith.constant dense<0.000000e+00> : vector<2x8xf32>
    %25 = vector.multi_reduction <add>, %24, %cst_19 [2] : vector<2x8x32xf32> to vector<2x8xf32>
    %26 = vector.shape_cast %25 : vector<2x8xf32> to vector<2x8x1xf32>
    %27 = arith.addf %20, %26 : vector<2x8x1xf32>
    %c0_20 = arith.constant 0 : index
    %c0_21 = arith.constant 0 : index
    %28 = vector.load %arg9[%c0_20, %c0_21] : memref<1x1xf32, #tpu.memory_space<vmem>>, vector<1x1xf32>
    %29 = vector.shape_cast %28 : vector<1x1xf32> to vector<1x1x1xf32>
    %30 = vector.broadcast %29 : vector<1x1x1xf32> to vector<2x8x1xf32>
    %31 = arith.addf %27, %30 : vector<2x8x1xf32>
    %c2_i32 = arith.constant 2 : i32
    %32 = arith.muli %arg0, %c2_i32 : i32
    %33 = tpu.iota {dimensions = array<i32: 1>} : vector<2x8x1xi32>
    %34 = tpu.iota {dimensions = array<i32: 0>} : vector<2x1x1xi32>
    %c0_i32 = arith.constant 0 : i32
    %35 = vector.broadcast %c0_i32 : i32 to vector<2x1x1xi32>
    %c0_i32_22 = arith.constant 0 : i32
    %36 = vector.broadcast %c0_i32_22 : i32 to vector<2x1x1xi32>
    %37 = arith.cmpi eq, %34, %36 : vector<2x1x1xi32>
    %c0_i32_23 = arith.constant 0 : i32
    %38 = arith.addi %32, %c0_i32_23 : i32
    %39 = arith.index_cast %38 : i32 to index
    %40 = memref.load %arg1[%39] : memref<2xi32, #tpu.memory_space<smem>>
    %41 = vector.broadcast %40 : i32 to vector<2x1x1xi32>
    %42 = arith.select %37, %41, %35 : vector<2x1x1xi1>, vector<2x1x1xi32>
    %c1_i32 = arith.constant 1 : i32
    %43 = vector.broadcast %c1_i32 : i32 to vector<2x1x1xi32>
    %44 = arith.cmpi eq, %34, %43 : vector<2x1x1xi32>
    %c1_i32_24 = arith.constant 1 : i32
    %45 = arith.addi %32, %c1_i32_24 : i32
    %46 = arith.index_cast %45 : i32 to index
    %47 = memref.load %arg1[%46] : memref<2xi32, #tpu.memory_space<smem>>
    %48 = vector.broadcast %47 : i32 to vector<2x1x1xi32>
    %49 = arith.select %44, %48, %42 : vector<2x1x1xi1>, vector<2x1x1xi32>
    %50 = vector.broadcast %49 : vector<2x1x1xi32> to vector<2x8x1xi32>
    %51 = arith.cmpi slt, %33, %50 : vector<2x8x1xi32>
    %cst_25 = arith.constant 0xFF800000 : f32
    %52 = vector.broadcast %cst_25 : f32 to vector<2x8x1xf32>
    %53 = arith.select %51, %31, %52 : vector<2x8x1xi1>, vector<2x8x1xf32>
    %cst_26 = arith.constant dense<0xFF800000> : vector<2x1xf32>
    %54 = vector.multi_reduction <maximumf>, %53, %cst_26 [1] : vector<2x8x1xf32> to vector<2x1xf32>
    %55 = vector.shape_cast %54 : vector<2x1xf32> to vector<2x1x1xf32>
    %56 = vector.broadcast %55 : vector<2x1x1xf32> to vector<2x8x1xf32>
    %57 = arith.subf %53, %56 : vector<2x8x1xf32>
    %58 = math.exp %57 : vector<2x8x1xf32>
    %cst_27 = arith.constant dense<0.000000e+00> : vector<2x1xf32>
    %59 = vector.multi_reduction <add>, %58, %cst_27 [1] : vector<2x8x1xf32> to vector<2x1xf32>
    %60 = vector.shape_cast %59 : vector<2x1xf32> to vector<2x1x1xf32>
    %61 = vector.broadcast %60 : vector<2x1x1xf32> to vector<2x8x1xf32>
    %62 = arith.divf %58, %61 : vector<2x8x1xf32>
    %63 = vector.broadcast %62 : vector<2x8x1xf32> to vector<2x8x32xf32>
    %64 = arith.mulf %63, %14 : vector<2x8x32xf32>
    %cst_28 = arith.constant dense<0.000000e+00> : vector<2x32xf32>
    %65 = vector.multi_reduction <add>, %64, %cst_28 [1] : vector<2x8x32xf32> to vector<2x32xf32>
    %66 = vector.broadcast %62 : vector<2x8x1xf32> to vector<2x8x32xf32>
    %67 = arith.mulf %66, %0 : vector<2x8x32xf32>
    %cst_29 = arith.constant dense<0.000000e+00> : vector<2x32xf32>
    %68 = vector.multi_reduction <add>, %67, %cst_29 [1] : vector<2x8x32xf32> to vector<2x32xf32>
    %c0_30 = arith.constant 0 : index
    %c0_31 = arith.constant 0 : index
    %69 = vector.load %arg10[%c0_30, %c0_31] : memref<32x3xf32, #tpu.memory_space<vmem>>, vector<32x3xf32>
    %cst_32 = arith.constant dense<0.000000e+00> : vector<2x3xf32>
    %70 = tpu.matmul %65, %69, %cst_32 {dimension_numbers = #tpu.dot_dimension_numbers<[1], [0], [0], [1], [0, 0, 1, 1], [], []>} : vector<2x32xf32>, vector<32x3xf32>, vector<2x3xf32> -> vector<2x3xf32>
    %c0_33 = arith.constant 0 : index
    %c0_34 = arith.constant 0 : index
    %71 = vector.load %arg11[%c0_33, %c0_34] : memref<32x3xf32, #tpu.memory_space<vmem>>, vector<32x3xf32>
    %cst_35 = arith.constant dense<0.000000e+00> : vector<2x3xf32>
    %72 = tpu.matmul %68, %71, %cst_35 {dimension_numbers = #tpu.dot_dimension_numbers<[1], [0], [0], [1], [0, 0, 1, 1], [], []>} : vector<2x32xf32>, vector<32x3xf32>, vector<2x3xf32> -> vector<2x3xf32>
    %73 = arith.addf %70, %72 : vector<2x3xf32>
    %c0_36 = arith.constant 0 : index
    %c0_37 = arith.constant 0 : index
    %74 = vector.load %arg12[%c0_36, %c0_37] : memref<1x3xf32, #tpu.memory_space<vmem>>, vector<1x3xf32>
    %75 = vector.broadcast %74 : vector<1x3xf32> to vector<2x3xf32>
    %76 = arith.addf %73, %75 : vector<2x3xf32>
    %c0_38 = arith.constant 0 : index
    %c0_39 = arith.constant 0 : index
    %77 = vector.load %arg14[%c0_38, %c0_39] : memref<2x3xf32, #tpu.memory_space<vmem>>, vector<2x3xf32>
    tpu.vector_store %arg14[%c0_38, %c0_39], %76 {strides = array<i32>} : memref<2x3xf32, #tpu.memory_space<vmem>>, vector<2x3xf32>,
    return
  }
  func.func @transform_0(%arg0: i32, %arg1: memref<2xi32, #tpu.memory_space<smem>>) -> (i32, i32, i32) {
    %c0_i32 = arith.constant 0 : i32
    %c0_i32_0 = arith.constant 0 : i32
    %c0_i32_1 = arith.constant 0 : i32
    return %arg0, %c0_i32, %c0_i32_0 : i32, i32, i32
  }
  func.func @transform_1(%arg0: i32, %arg1: memref<2xi32, #tpu.memory_space<smem>>) -> (i32, i32) {
    %c0_i32 = arith.constant 0 : i32
    %c0_i32_0 = arith.constant 0 : i32
    %c0_i32_1 = arith.constant 0 : i32
    return %c0_i32, %c0_i32_0 : i32, i32
  }
  func.func @transform_2(%arg0: i32, %arg1: memref<2xi32, #tpu.memory_space<smem>>) -> (i32, i32) {
    %c0_i32 = arith.constant 0 : i32
    %c0_i32_0 = arith.constant 0 : i32
    %c0_i32_1 = arith.constant 0 : i32
    return %c0_i32, %c0_i32_0 : i32, i32
  }
  func.func @transform_3(%arg0: i32, %arg1: memref<2xi32, #tpu.memory_space<smem>>) -> (i32, i32) {
    %c0_i32 = arith.constant 0 : i32
    %c0_i32_0 = arith.constant 0 : i32
    %c0_i32_1 = arith.constant 0 : i32
    return %c0_i32, %c0_i32_0 : i32, i32
  }
  func.func @transform_4(%arg0: i32, %arg1: memref<2xi32, #tpu.memory_space<smem>>) -> (i32, i32) {
    %c0_i32 = arith.constant 0 : i32
    %c0_i32_0 = arith.constant 0 : i32
    %c0_i32_1 = arith.constant 0 : i32
    return %c0_i32, %c0_i32_0 : i32, i32
  }
  func.func @transform_5(%arg0: i32, %arg1: memref<2xi32, #tpu.memory_space<smem>>) -> (i32, i32) {
    %c0_i32 = arith.constant 0 : i32
    %c0_i32_0 = arith.constant 0 : i32
    %c0_i32_1 = arith.constant 0 : i32
    return %c0_i32, %c0_i32_0 : i32, i32
  }
  func.func @transform_6(%arg0: i32, %arg1: memref<2xi32, #tpu.memory_space<smem>>) -> (i32, i32) {
    %c0_i32 = arith.constant 0 : i32
    %c0_i32_0 = arith.constant 0 : i32
    %c0_i32_1 = arith.constant 0 : i32
    return %c0_i32, %c0_i32_0 : i32, i32
  }
  func.func @transform_7(%arg0: i32, %arg1: memref<2xi32, #tpu.memory_space<smem>>) -> (i32, i32) {
    %c0_i32 = arith.constant 0 : i32
    %c0_i32_0 = arith.constant 0 : i32
    %c0_i32_1 = arith.constant 0 : i32
    return %c0_i32, %c0_i32_0 : i32, i32
  }
  func.func @transform_8(%arg0: i32, %arg1: memref<2xi32, #tpu.memory_space<smem>>) -> (i32, i32) {
    %c0_i32 = arith.constant 0 : i32
    %c0_i32_0 = arith.constant 0 : i32
    %c0_i32_1 = arith.constant 0 : i32
    return %c0_i32, %c0_i32_0 : i32, i32
  }
  func.func @transform_9(%arg0: i32, %arg1: memref<2xi32, #tpu.memory_space<smem>>) -> (i32, i32) {
    %c0_i32 = arith.constant 0 : i32
    %c0_i32_0 = arith.constant 0 : i32
    %c0_i32_1 = arith.constant 0 : i32
    return %c0_i32, %c0_i32_0 : i32, i32
  }
  func.func @transform_10(%arg0: i32, %arg1: memref<2xi32, #tpu.memory_space<smem>>) -> (i32, i32) {
    %c0_i32 = arith.constant 0 : i32
    %c0_i32_0 = arith.constant 0 : i32
    %c0_i32_1 = arith.constant 0 : i32
    return %c0_i32, %c0_i32_0 : i32, i32
  }
  func.func @transform_11(%arg0: i32, %arg1: memref<2xi32, #tpu.memory_space<smem>>) -> (i32, i32, i32) {
    %c0_i32 = arith.constant 0 : i32
    %c0_i32_0 = arith.constant 0 : i32
    %c0_i32_1 = arith.constant 0 : i32
    return %arg0, %c0_i32, %c0_i32_0 : i32, i32, i32
  }
  func.func @transform_12(%arg0: i32, %arg1: memref<2xi32, #tpu.memory_space<smem>>) -> (i32, i32) {
    %c0_i32 = arith.constant 0 : i32
    %c0_i32_0 = arith.constant 0 : i32
    return %arg0, %c0_i32 : i32, i32
  }
}

</mosaic_0001>

<bundles_post_ra>
// kernel: tpu_custom_call.1
= control target key start
LH: loop header
LB: loop body
LE: loop exit
PB: predicated region body
PF: predicated region fallthrough
CT: control target
= control target key end

     0   :  { %s923_s0 = inlined_call_operand.vmem [shape: s32[2], index: 0, kind: input, shape index: {}]   ;;  %s924_s1 = inlined_call_operand.vmem [shape: f32[2,8,32], index: 1, kind: input, shape index: {}]   ;;  %s925_s2 = inlined_call_operand.vmem [shape: f32[32,3], index: 2, kind: input, shape index: {}]   ;;  %s926_s3 = inlined_call_operand.vmem [shape: f32[1,3], index: 3, kind: input, shape index: {}]   ;;  %s927_s4 = inlined_call_operand.vmem [shape: f32[32,32], index: 4, kind: input, shape index: {}]   ;;  %s928_s5 = inlined_call_operand.vmem [shape: f32[1,32], index: 5, kind: input, shape index: {}]   ;;  %s929_s6 = inlined_call_operand.vmem [shape: f32[1,32], index: 6, kind: input, shape index: {}]   ;;  %s930_s7 = inlined_call_operand.vmem [shape: f32[1,32], index: 7, kind: input, shape index: {}]   ;;  %s931_s9 = inlined_call_operand.vmem [shape: f32[32,3], index: 9, kind: input, shape index: {}]   ;;  %s932_s10 = inlined_call_operand.vmem [shape: f32[32,3], index: 10, kind: input, shape index: {}]   ;;  %s933_s11 = inlined_call_operand.vmem [shape: f32[1,3], index: 11, kind: input, shape index: {}]   ;;  %s934_s12 = inlined_call_operand.vmem [shape: f32[2,8,3], index: 12, kind: output, shape index: {0}]   ;;  %s935_s13 = inlined_call_operand.hbm [shape: f32[2,3], index: 13, kind: output, shape index: {1}]   ;;  %s936_s8 = inlined_call_operand.<no memory space> [shape: f32[1,1], index: 8, kind: input, shape index: {}]  }
   0x1   :  { %s19_s27 = sshll.u32 %s923_s0, 4  ;;  %v23_v0 = vstv %s936_s8  ;;  %s20_s27 = int_to_ptr.vmem [resolvable:$true] %s19_s27 }
   0x2   :  { %24 = vst [vmem:[#allocation4] sm:$0x1] %v23_v0  ;;  %s678_s30 = scalar_lea.vmem %s20_s27, 16  ;;  %p683_p1 = scmp.lt.s32.totalorder %s20_s27, %s20_s27 }
   0x3   :  { %p679_p0 = scmp.ne.s32.totalorder %s20_s27, %s678_s30  ;;  %p684_p2 = scmp.lt.s32.totalorder %s678_s30, %s678_s30 }
   0x5   :  { %p685_p3 = por %p684_p2, %p683_p1 }
   0x7   :  { %p686_p4 = pnand %p685_p3, %p679_p0 }
   0x9   :  { %689 = shalt.err (!%p686_p4)  }
   0xa   :  { %s716_s14 = smov [#allocation3]  }
   0xb   :  { %22 = dma.vmem_to_smem %s20_s27, 16, %s716_s14, [#allocation2] }
   0xc   :  { %712 = dma.done.wait [#allocation2], 16 }
   0xd   :  { %713 = vsyncadd [#allocation2], 4294967280 }
   0xe   :  { %26 = sfence }
   0xf   :  { %v148_v1 = vld [vmem:[%s927_s4] sm:$0xff]  ;;  %v149_v2 = vld [vmem:[%s927_s4 + $0x8] sm:$0xff]  ;;  %v150_v3 = vld [vmem:[%s927_s4 + $0x10] sm:$0xff]  ;;  %vm63_vm0 = vcmask 261120  }
  0x10   :  { %v642_v4 = vpack.c.bf16 %v149_v2, %v148_v1  ;;  %v151_v5 = vld [vmem:[%s927_s4 + $0x18] sm:$0xff]  ;;  %v813_v6 = vld [vmem:[%s924_s1] sm:$0xff] }
  0x11   :  { %v646_v7 = vpack.c.bf16 %v151_v5, %v150_v3  ;;  %609 = vmatprep.mubr.msk.f32.mxu1 %vm63_vm0, %v813_v6  ;;  %598 = vmatprep.mubr.msk.f32.mxu0 %vm63_vm0, %v813_v6 }
  0x12   :  { %27 = vsyncpa [#allocation6], 0  ;;  %643 = vmatprep.subr.bf16.mxu1 %v642_v4  ;;  %v822_v8 = vld [vmem:[%s924_s1 + $0x8] sm:$0xff]  ;;  %v562_v9 = vld [vmem:[%s930_s7] ss:$0 sm:$0xff]  ;;  %v717_v24 = vmov 0   ;;  %v276_v25 = vlaneseq }
  0x13   :  { %645 = vmatpush3.bf16.msra.mxu1 %v642_v4  ;;  %v256_v10 = vmul.f32 %v562_v9, %v813_v6  ;;  %v257_v12 = vmul.f32 %v562_v9, %v822_v8  ;;  %v558_v14 = vld [vmem:[%s928_s5] ss:$0 sm:$0xff]  ;;  %668 = vset.pattern.permute.xlu0 %v717_v24  ;;  %s278_s5 = sld [smem:[#allocation3]]  ;;  %vm287_vm2 = vcmask 7168   ;;  %vm719_vm4 = vmmov 0  }
  0x14   :  { %647 = vmatprep.subr.bf16.mxu1 %v646_v7  ;;  %v561_v17 = vld [vmem:[%s929_s6] ss:$0 sm:$0xff]  ;;  %669 = vset.pattern.permute.xlu1 %v717_v24  ;;  %s564_s6 = sld [smem:[#allocation3 + $0x1]]  ;;  %v277_v27 = vshrl.u32 %v276_v25, 7  ;;  %v373_v25 = vld [vmem:[%s932_s10 + $0x8] sm:$0xff]  ;;  %vm378_vm5 = vcmask 1041409  }
  0x15   :  { %v258_v11 = vsel %vm63_vm0, %v256_v10, 0.0  ;;  %v261_v13 = vsel %vm63_vm0, %v257_v12, 0.0  ;;  %v563_v29 = vld [vmem:[#allocation4] ss:$0 sm:$0xff]  ;;  %vm145_vm6 = vcmask 23552   ;;  %vm535_vm7 = vcmask 17408  }
  0x16   :  { %259 = vadd.xlane.f32.xlu1 %v258_v11  ;;  %v372_v24 = vld [vmem:[%s932_s10] sm:$0xff] }
  0x17   :  { %649 = vmatpush3.bf16.msra.mxu1 %v646_v7 }
  0x19   :  { %v279_v28 = vstv %s278_s5 }
  0x1a   :  { %610 = vmatmul.mubr.msk.f32.vlgmr.msra.gmra.mrb[0].mxu1 %vm63_vm0, %v822_v8  ;;  %262 = vadd.xlane.f32.xlu1 %v261_v13  ;;  %vm283_vm1 = vcmp.lt.s32.totalorder %v277_v27, %v279_v28  ;;  %v282_v34 = vstv %s564_s6  ;;  %v369_v28 = vld [vmem:[%s931_s9 + $0x8] sm:$0xff] }
  0x1b   :  { %vm284_vm3 = vcmp.lt.s32.totalorder %v277_v27, %v282_v34  ;;  %v651_v27 = vpack.c.bf16 %v373_v25, %v372_v24 }
  0xa3   :  { %v260_v26 = vpop.xlane.xlu1 %259 }
  0xa7   :  { %v263_v32 = vpop.xlane.xlu1 %262 }
  0xed   :  { %v611_v15 = vpop.f32.mrb[0].mxu1 }
  0xee   :  { %v225_v16 = vpop.f32.mrb[1].mxu1  ;;  %v839_v18 = vadd.f32 %v611_v15, %v558_v14  ;;  %v52_v15 = vld [vmem:[%s925_s2] sm:$0xff] }
  0xef   :  { %v841_v19 = vadd.f32 %v558_v14, %v225_v16  ;;  %v53_v16 = vld [vmem:[%s925_s2 + $0x8] sm:$0xff] }
  0xf0   :  { %v242_v22 = vmul.f32 %v561_v17, %v839_v18 }
  0xf1   :  { %v241_v20 = vmul.f32 %v561_v17, %v841_v19 }
  0xf2   :  { %v246_v23 = vsel %vm63_vm0, %v242_v22, 0.0  ;;  %v55_v22 = vld [vmem:[%s925_s2 + $0x18] sm:$0xff] }
  0xf3   :  { %v243_v21 = vsel %vm63_vm0, %v241_v20, 0.0  ;;  %v634_v20 = vpack.c.bf16 %v53_v16, %v52_v15  ;;  %v567_v15 = vld [vmem:[%s933_s11] ss:$0 sm:$0xff] }
  0xf4   :  { %244 = vadd.xlane.f32.xlu0 %v243_v21  ;;  %v54_v21 = vld [vmem:[%s925_s2 + $0x10] sm:$0xff] }
  0xf5   :  { %635 = vmatprep.subr.bf16.mxu0 %v634_v20 }
  0xf6   :  { %637 = vmatpush3.bf16.msra.mxu0 %v634_v20 }
  0xf8   :  { %247 = vadd.xlane.f32.xlu0 %v246_v23  ;;  %v638_v23 = vpack.c.bf16 %v55_v22, %v54_v21 }
  0xfa   :  { %639 = vmatprep.subr.bf16.mxu0 %v638_v23 }
  0xfb   :  { %641 = vmatpush3.bf16.msra.mxu0 %v638_v23 }
  0xfe   :  { %599 = vmatmul.mubr.msk.f32.vlgmr.msra.gmra.mrb[0].mxu0 %vm63_vm0, %v822_v8 }
 0x181   :  { %v245_v30 = vpop.xlane.xlu0 %244 }
 0x182   :  { %v264_v31 = vadd.f32 %v260_v26, %v245_v30  ;;  %v368_v26 = vld [vmem:[%s931_s9] sm:$0xff] }
 0x183   :  { %v657_v30 = vpack.c.bf16 %v369_v28, %v368_v26 }
 0x184   :  { %v273_v33 = vadd.f32 %v563_v29, %v264_v31  ;;  %v374_v31 = vld [vmem:[%s932_s10 + $0x10] sm:$0xff] }
 0x185   :  { %v248_v35 = vpop.xlane.xlu0 %247 }
 0x186   :  { %v285_v36 = vsel %vm283_vm1, %v273_v33, -inf  ;;  %v265_v37 = vadd.f32 %v263_v32, %v248_v35  ;;  %v375_v32 = vld [vmem:[%s932_s10 + $0x18] sm:$0xff]  ;;  %v370_v33 = vld [vmem:[%s931_s9 + $0x10] sm:$0xff] }
 0x187   :  { %v288_v38 = vsel %vm287_vm2, %v285_v36, -inf  ;;  %v654_v34 = vpack.c.bf16 %v375_v32, %v374_v31  ;;  %v371_v35 = vld [vmem:[%s931_s9 + $0x18] sm:$0xff] }
 0x188   :  { %v289_v39 = vrot.slane %v288_v38, 4  ;;  %v274_v40 = vadd.f32 %v563_v29, %v265_v37  ;;  %v718_v29 = vmov 0.0|0.0   ;;  %v720_v37 = vmov 0.0  }
 0x189   :  { %650 = vmatprep.subr.bf16.mxu0 %v718_v29  ;;  %656 = vmatprep.subr.bf16.mxu1 %v718_v29 }
 0x18a   :  { %v290_v41 = vmax.f32 %v288_v38, %v289_v39  ;;  %v286_v42 = vsel %vm284_vm3, %v274_v40, -inf  ;;  %652 = vmatpush3.bf16.msra.mxu0 %v651_v27  ;;  %658 = vmatpush3.bf16.msra.mxu1 %v657_v30 }
 0x18b   :  { %v295_v43 = vsel %vm287_vm2, %v286_v42, -inf  ;;  %653 = vmatprep.subr.bf16.mxu0 %v718_v29  ;;  %659 = vmatprep.subr.bf16.mxu1 %v718_v29 }
 0x18c   :  { %v291_v44 = vrot.slane %v290_v41, 2  ;;  %v296_v45 = vrot.slane %v295_v43, 4  ;;  %620 = vmatprep.mubr.msk.f32.mxu0 %vm719_vm4, %v720_v37  ;;  %631 = vmatprep.mubr.msk.f32.mxu1 %vm719_vm4, %v720_v37 }
 0x18e   :  { %v292_v46 = vmax.f32 %v290_v41, %v291_v44  ;;  %v297_v47 = vmax.f32 %v295_v43, %v296_v45  ;;  %655 = vmatpush3.bf16.msra.mxu0 %v654_v34 }
 0x190   :  { %v293_v48 = vrot.slane %v292_v46, 1  ;;  %v298_v49 = vrot.slane %v297_v47, 2 }
 0x192   :  { %v294_v50 = vmax.f32 %v292_v46, %v293_v48  ;;  %v299_v51 = vmax.f32 %v297_v47, %v298_v49 }
 0x194   :  { %v302_v52 = vsub.f32 %v285_v36, %v294_v50  ;;  %v300_v53 = vrot.slane %v299_v51, 1  ;;  %v660_v36 = vpack.c.bf16 %v371_v35, %v370_v33 }
 0x196   :  { %v304_v54 = vmul.f32 1.442695, %v302_v52  ;;  %v301_v55 = vmax.f32 %v299_v51, %v300_v53  ;;  %661 = vmatpush3.bf16.msra.mxu1 %v660_v36 }
 0x198   :  { %670 = vpow2.f32 %v304_v54  ;;  %v303_v56 = vsub.f32 %v286_v42, %v301_v55 }
 0x19a   :  { %v306_v57 = vmul.f32 1.442695, %v303_v56 }
 0x19c   :  { %672 = vpow2.f32 %v306_v57 }
 0x1a2   :  { %v671_v58 = vpop.eup %670 }
 0x1a3   :  { %v308_v59 = vsel %vm287_vm2, %v671_v58, 0.0 }
 0x1a4   :  { %v309_v60 = vrot.slane %v308_v59, 4 }
 0x1a6   :  { %v673_v61 = vpop.eup %672  ;;  %v310_v62 = vadd.f32 %v309_v60, %v308_v59 }
 0x1a7   :  { %v315_v63 = vsel %vm287_vm2, %v673_v61, 0.0 }
 0x1a8   :  { %v311_v0 = vrot.slane %v310_v62, 2  ;;  %v316_v1 = vrot.slane %v315_v63, 4 }
 0x1aa   :  { %v312_v2 = vadd.f32 %v311_v0, %v310_v62  ;;  %v317_v3 = vadd.f32 %v316_v1, %v315_v63 }
 0x1ac   :  { %v313_v4 = vrot.slane %v312_v2, 1  ;;  %v318_v5 = vrot.slane %v317_v3, 2 }
 0x1ae   :  { %v314_v7 = vadd.f32 %v313_v4, %v312_v2  ;;  %v319_v9 = vadd.f32 %v318_v5, %v317_v3 }
 0x1b0   :  { %674 = vrcp.f32 %v314_v7  ;;  %v320_v10 = vrot.slane %v319_v9, 1  ;;  %v555_v7 = vld [vmem:[%s926_s3] ss:$0 sm:$0xff]  ;;  %s721_s3 = smov [#allocation5]  }
 0x1b1   :  { %s545_s0 = sshll.u32 %s721_s3, 4  ;;  %s546_s0 = int_to_ptr.vmem [resolvable:$true] %s545_s0 }
 0x1b2   :  { %v321_v11 = vadd.f32 %v320_v10, %v319_v9  ;;  %s690_s16 = scalar_lea.vmem %s546_s0, 32  ;;  %p695_p6 = scmp.lt.s32.totalorder %s546_s0, %s546_s0 }
 0x1b3   :  { %p691_p5 = scmp.ne.s32.totalorder %s546_s0, %s690_s16  ;;  %p696_p7 = scmp.lt.s32.totalorder %s690_s16, %s690_s16 }
 0x1b4   :  { %676 = vrcp.f32 %v321_v11 }
 0x1b5   :  { %p697_p8 = por %p696_p7, %p695_p6 }
 0x1b7   :  { %p698_p9 = pnand %p697_p8, %p691_p5 }
 0x1ba   :  { %v675_v12 = vpop.eup %674 }
 0x1bb   :  { %v323_v13 = vmul.f32 %v675_v12, %v671_v58 }
 0x1bd   :  { %328 = vperm.xlu0 %668, %v323_v13  }
 0x1be   :  { %v677_v14 = vpop.eup %676 }
 0x1bf   :  { %v325_v17 = vmul.f32 %v677_v14, %v673_v61 }
 0x1c1   :  { %333 = vperm.xlu1 %669, %v325_v17  }
 0x1d1   :  { %v600_v9 = vpop.f32.mrb[0].mxu0 }
 0x1d2   :  { %v142_v10 = vadd.f32 %v600_v9, %v555_v7  ;;  %v136_v11 = vpop.f32.mrb[1].mxu0 }
 0x1d3   :  { %v137_v12 = vadd.f32 %v555_v7, %v136_v11 }
 0x1d4   :  { %147 = vst.msk [vmem:[%s934_s12 + $0x8] sm:$0xff] %vm145_vm6, %v142_v10 }
 0x1d5   :  { %146 = vst.msk [vmem:[%s934_s12] sm:$0xff] %vm145_vm6, %v137_v12 }
 0x23c   :  { %v329_v38 = vpop.permute.xlu0 %328 }
 0x23d   :  { %v336_v39 = vmul.f32 %v329_v38, %v841_v19  ;;  %v352_v40 = vmul.f32 %v329_v38, %v813_v6 }
 0x23f   :  { %v338_v41 = vsel %vm63_vm0, %v336_v39, 0.0  ;;  %v354_v42 = vsel %vm63_vm0, %v352_v40, 0.0 }
 0x240   :  { %v339_v43 = vrot.slane %v338_v41, 4  ;;  %v355_v44 = vrot.slane %v354_v42, 4  ;;  %v334_v45 = vpop.permute.xlu1 %333 }
 0x241   :  { %v337_v46 = vmul.f32 %v334_v45, %v839_v18  ;;  %v353_v47 = vmul.f32 %v334_v45, %v822_v8 }
 0x242   :  { %v340_v48 = vadd.f32 %v339_v43, %v338_v41  ;;  %v356_v49 = vadd.f32 %v355_v44, %v354_v42 }
 0x243   :  { %v345_v50 = vsel %vm63_vm0, %v337_v46, 0.0  ;;  %v361_v51 = vsel %vm63_vm0, %v353_v47, 0.0 }
 0x244   :  { %v341_v19 = vrot.slane %v340_v48, 2  ;;  %v357_v52 = vrot.slane %v356_v49, 2  ;;  %v346_v6 = vrot.slane %v345_v50, 4  ;;  %v362_v53 = vrot.slane %v361_v51, 4 }
 0x246   :  { %v342_v54 = vadd.f32 %v341_v19, %v340_v48  ;;  %v358_v55 = vadd.f32 %v357_v52, %v356_v49  ;;  %v347_v56 = vadd.f32 %v346_v6, %v345_v50  ;;  %v363_v57 = vadd.f32 %v362_v53, %v361_v51 }
 0x248   :  { %v348_v58 = vrot.slane %v347_v56, 2  ;;  %v364_v59 = vrot.slane %v363_v57, 2  ;;  %v343_v60 = vrot.slane %v342_v54, 1  ;;  %v359_v18 = vrot.slane %v358_v55, 1 }
 0x24a   :  { %v349_v61 = vadd.f32 %v348_v58, %v347_v56  ;;  %v365_v8 = vadd.f32 %v364_v59, %v363_v57  ;;  %v344_v0 = vadd.f32 %v343_v60, %v342_v54  ;;  %v360_v1 = vadd.f32 %v359_v18, %v358_v55 }
 0x24c   :  { %v350_v62 = vrot.slane %v349_v61, 1  ;;  %v366_v63 = vrot.slane %v365_v8, 1 }
 0x24e   :  { %v351_v2 = vadd.f32 %v350_v62, %v349_v61  ;;  %v367_v3 = vadd.f32 %v366_v63, %v365_v8 }
 0x250   :  { %v379_v4 = vsel %vm378_vm5, %v367_v3, %v360_v1  ;;  %v454_v5 = vsel %vm378_vm5, %v351_v2, %v344_v0 }
 0x251   :  { %621 = vmatmul.mubr.msk.f32.vlgmr.msra.gmra.mrb[2].mxu0 %vm63_vm0, %v379_v4  ;;  %632 = vmatmul.mubr.msk.f32.vlgmr.msra.gmra.mrb[2].mxu1 %vm63_vm0, %v454_v5 }
 0x324   :  { %v448_v13 = vpop.f32.mrb[2].mxu0  ;;  %v523_v14 = vpop.f32.mrb[2].mxu1 }
 0x325   :  { %v524_v16 = vadd.f32 %v523_v14, %v448_v13  ;;  %v622_v17 = vpop.f32.mrb[3].mxu0  ;;  %v633_v20 = vpop.f32.mrb[3].mxu1 }
 0x327   :  { %v534_v21 = vadd.f32 %v567_v15, %v524_v16 }
 0x329   :  { %536 = vst.msk [vmem:[#allocation5] sm:$0x3] %vm535_vm7, %v534_v21 }
 0x32a   :  { %701 = shalt.err (!%p698_p9)
}
 0x32b   :  { %s702_s11 = scalar_lea.hbm %s935_s13, 32 }
 0x32c   :  { %p703_p10 = scmp.ne.s32.totalorder %s935_s13, %s702_s11  ;;  %p706_p11 = scmp.lt.u32.totalorder %s702_s11, %s935_s13 }
 0x32e   :  { %p708_p12 = pnand %p706_p11, %p703_p10 }
 0x330   :  { %711 = shalt.err (!%p708_p12)
}
 0x331   :  { %548 = dma.vmem_to_hbm [thread:$0]  %s546_s0, 32, %s935_s13, [#allocation6]  }
 0x332   :  { %714 = dma.done.wait [#allocation6], 32  }
 0x333   :  { %715 = vsyncadd [#allocation6], 4294967264 }
 0x334   :  { %554 = vsyncpa [#allocation6], 1 }

</bundles_post_ra>
